<compile_context>
chip_gen: v7x
topology: tpu7x:2x2x1
jax: 0.10.0
libtpu: 0.0.40
codegen_flags: <defaults>
</compile_context>

<pallas_src>
import functools
import math

import jax
import jax.numpy as jnp
from jax import lax
from jax.experimental import pallas as pl
from jax.experimental.pallas import tpu as pltpu


def _round_up(x, m):
    return (x + m - 1) // m * m


def _cdiv(a, b):
    return -(-a // b)


def _vmem_capacity_bytes():
    """Physical VMEM per TensorCore; conservative 64 MiB fallback (safe on v7x)."""
    try:
        return int(pltpu.get_tpu_info().vmem_capacity_bytes)
    except Exception:
        return 64 * 1024 * 1024


def _num_tensorcores_per_device():
    """Best-effort TC-per-device detection; defaults to 1 (v5e/v6e)."""
    try:
        dev = jax.devices()[0]
        for attr in ('num_cores', 'core_count', 'num_cores_per_chip'):
            v = getattr(dev, attr, None)
            if isinstance(v, int) and v > 1:
                return v
    except Exception:
        pass
    return 1


# ----------------------------- kernels ------------------------------------- #

def _sum_mean_kernel(seg_ref, hs_ref, out_ref, *maybe_cnt, mean):
    step = pl.program_id(1)

    @pl.when(step == 0)
    def _init():
        out_ref[...] = jnp.zeros(out_ref.shape, out_ref.dtype)
        if mean:
            maybe_cnt[0][...] = jnp.zeros(maybe_cnt[0].shape, maybe_cnt[0].dtype)

    seg = seg_ref[...]                                  # (1, TN) int32, -1 == padding
    hs = hs_ref[...]                                    # (TN, D) f32
    g_pad = out_ref.shape[0]
    tn = seg.shape[1]

    gid = lax.broadcasted_iota(jnp.int32, (g_pad, tn), 0)          # (G_pad, TN)
    onehot = (gid == seg).astype(jnp.float32)                      # (G_pad, TN)

    # Segment sum: (G_pad, TN) @ (TN, D) on the MXU, contraction on native axes.
    out_ref[...] += jnp.dot(onehot, hs, preferred_element_type=jnp.float32)

    if mean:
        # Counts via a lane reduce of the one-hot (no second matmul); the divide
        # happens in the wrapper after merging the per-core partials.
        maybe_cnt[0][...] += jnp.sum(onehot, axis=1, keepdims=True)


def _max_kernel(seg_ref, hs_ref, out_ref, *maybe_tmax):
    step = pl.program_id(1)

    @pl.when(step == 0)
    def _init():
        out_ref[...] = jnp.full(out_ref.shape, -jnp.inf, out_ref.dtype)

    seg = seg_ref[...]                                  # (TN, 1) int32, -1 == padding
    hs = hs_ref[...]                                    # (TN, D) f32
    g_pad, d = out_ref.shape
    n_chunks = g_pad // 8

    def chunk_rows(base):                               # 8 graphs -> (8, D)
        rows = []
        for j in range(8):
            g = base + j
            rows.append(jnp.max(jnp.where(seg == g, hs, -jnp.inf),
                                axis=0, keepdims=True))
        return jnp.concatenate(rows, axis=0)

    if not maybe_tmax:
        # Small G: static unroll; tile maxima assembled in registers, one
        # full-block unmasked accumulator update.
        tile_max = jnp.concatenate([chunk_rows(c * 8) for c in range(n_chunks)],
                                   axis=0)              # (G_pad, D)
        out_ref[...] = jnp.maximum(out_ref[...], tile_max)
    else:
        # Large G: bounded loop; each iteration handles 8 graphs and writes one
        # aligned 8-row chunk into the scratch via a leading-index store.
        tmax_ref = maybe_tmax[0]                        # (G_pad//8, 8, D)

        def body(c, carry):
            tmax_ref[c] = chunk_rows(c * 8)
            return carry

        lax.fori_loop(0, n_chunks, body, 0)
        out_ref[...] = jnp.maximum(out_ref[...], tmax_ref[...].reshape(g_pad, d))


def _attention_kernel(seg_ref, hs_ref, w1_ref, b1_ref, scale_ref, shift_ref,
                      w2r_ref, b2_ref, out_ref, m_ref, l_ref):
    step = pl.program_id(1)

    @pl.when(step == 0)
    def _init():
        out_ref[...] = jnp.zeros(out_ref.shape, out_ref.dtype)
        m_ref[...] = jnp.full(m_ref.shape, -jnp.inf, m_ref.dtype)
        l_ref[...] = jnp.zeros(l_ref.shape, l_ref.dtype)

    seg = seg_ref[...]                                  # (1, TN) int32, -1 == padding
    hs = hs_ref[...]                                    # (TN, D) f32
    g_pad = out_ref.shape[0]
    tn = seg.shape[1]

    # gate_nn: Linear(D, 2D) -> BatchNorm1d(2D) (eval mode, folded) -> ReLU
    #          -> Linear(2D, 1).  The first projection runs in w1's dtype
    #          (bf16 on large-D configs) with f32 accumulation.
    h1 = jnp.dot(hs.astype(w1_ref.dtype), w1_ref[...],
                 preferred_element_type=jnp.float32) + b1_ref[...]
    h1 = jnp.maximum(h1 * scale_ref[...] + shift_ref[...], 0.0)       # (TN, Hp)
    # Second projection against an 8-row replicated weight (q@k^T-style
    # contraction): output (8, TN) keeps the per-node gate lane-dense.
    gate8 = lax.dot_general(w2r_ref[...], h1, (((1,), (1,)), ((), ())),
                            preferred_element_type=jnp.float32)       # (8, TN)
    gate = gate8[0:1, :] + b2_ref[...]                                 # (1, TN)

    gid = lax.broadcasted_iota(jnp.int32, (g_pad, tn), 0)
    member = gid == seg                                                # (G_pad, TN)
    onehot = member.astype(jnp.float32)
    valid = seg >= 0                                                   # (1, TN)

    # Online (flash-style) per-segment softmax; NaN-producing branches are always
    # the deselected ones of the jnp.where's (do not "simplify" them away).
    m_old = m_ref[...]                                                 # (G_pad, 1)
    m_tile = jnp.max(jnp.where(member, gate, -jnp.inf), axis=1, keepdims=True)
    m_new = jnp.maximum(m_old, m_tile)
    rescale = jnp.where(m_old == -jnp.inf, 0.0, jnp.exp(m_old - m_new))
    m_safe = jnp.where(m_new == -jnp.inf, 0.0, m_new)

    # Gather each node's segment max (sublane reduce of the one-hot), then exp.
    m_per_node = jnp.sum(onehot * m_safe, axis=0, keepdims=True)       # (1, TN)
    e = jnp.where(valid, jnp.exp(gate - m_per_node), 0.0)              # (1, TN)
    w = onehot * e                                                     # (G_pad, TN)

    l_ref[...] = rescale * l_ref[...] + jnp.sum(w, axis=1, keepdims=True)
    out_ref[...] = rescale * out_ref[...] + jnp.dot(
        w, hs, preferred_element_type=jnp.float32)
    m_ref[...] = m_new
    # Normalization happens in the wrapper after merging per-core partials.


# ----------------------------- module -------------------------------------- #

class GraphBatch:
    """Minimal stand-in for a PyG Batch: only `.batch` and `.num_graphs`."""

    def __init__(self, batch, num_graphs):
        self.batch = batch
        self.num_graphs = num_graphs


class ReadoutLayer:
    """JAX/Pallas port of ReadoutLayer.forward(hs, gs)."""

    def __init__(self, params, key=None):
        self.graph_pooling = params['pooling']
        self.embed_dim = params['emb_dim']
        # None -> generation-aware auto sizing in __call__.
        self.block_n = params.get('block_n', None)
        if self.graph_pooling in ('sum', 'mean', 'max'):
            pass
        elif self.graph_pooling == 'attention':
            d = self.embed_dim
            h = 2 * d
            h_pad = _round_up(h, 128)
            self.h = h
            self.h_pad = h_pad
            key = key if key is not None else jax.random.PRNGKey(42)
            k1, k2, k3, k4 = jax.random.split(key, 4)
            lim1 = 1.0 / math.sqrt(d)
            lim2 = 1.0 / math.sqrt(h)
            # Unpadded f32 parameters (reference semantics of the torch module).
            self.w1 = jax.random.uniform(k1, (d, h), jnp.float32, -lim1, lim1)
            self.b1 = jax.random.uniform(k2, (1, h), jnp.float32, -lim1, lim1)
            self.w2 = jax.random.uniform(k3, (h, 1), jnp.float32, -lim2, lim2)
            self.b2 = jax.random.uniform(k4, (1, 1), jnp.float32, -lim2, lim2)
            # BatchNorm1d(2D) in eval mode with fresh running stats, folded.
            gamma = jnp.ones((1, h), jnp.float32)
            beta = jnp.zeros((1, h), jnp.float32)
            rmean = jnp.zeros((1, h), jnp.float32)
            rvar = jnp.ones((1, h), jnp.float32)
            eps = 1e-5
            self.bn_scale = gamma / jnp.sqrt(rvar + eps)
            self.bn_shift = beta - rmean * self.bn_scale
            # bf16 for the D->2D gate projection once the MLP dominates (D>=256);
            # pooling matmul / accumulators stay f32.
            self.gate_dtype = params.get(
                'gate_dtype', jnp.bfloat16 if d >= 256 else jnp.float32)
            # Zero-pad the hidden dim to a lane multiple: exact (ReLU(0)=0, zero
            # w2 rows contribute nothing), gives lane-dense unmasked stores.
            pad = h_pad - h
            self.w1_kernel = jnp.pad(self.w1, ((0, 0), (0, pad))).astype(self.gate_dtype)
            self.b1_kernel = jnp.pad(self.b1, ((0, 0), (0, pad)))
            self.bn_scale_kernel = jnp.pad(self.bn_scale, ((0, 0), (0, pad)),
                                           constant_values=1.0)
            self.bn_shift_kernel = jnp.pad(self.bn_shift, ((0, 0), (0, pad)))
            w2_row = jnp.pad(self.w2.reshape(1, h), ((0, 0), (0, pad)))
            # 8-row replicated second-layer weight keeps the gate matmul lane-dense.
            self.w2_rep = jnp.tile(w2_row, (8, 1))
        else:
            # TODO(synk): set2set / sagpool / graphunetpool readouts not ported.
            raise ValueError('Invalid or unsupported graph pooling type.')

    # ---------------- sizing ---------------- #

    def _pick_block_n(self, n, d, g_pad, vmem_limit, max_tn):
        n_ceil = _round_up(max(n, 1), 128)
        if self.block_n is not None:
            return min(_round_up(int(self.block_n), 128), n_ceil)
        budget = int(vmem_limit * 0.6)
        # Per-node bytes: double-buffered hs tile + seg row + one-hot temporaries.
        per_node = 2 * d * 4 + 8 + 2 * g_pad * 4
        fixed = g_pad * d * 4 + 4 * g_pad * 4
        if self.graph_pooling == 'attention':
            itemsize = jnp.dtype(self.gate_dtype).itemsize
            per_node += self.h_pad * 4 + 2 * g_pad * 4 + 2 * d
            fixed += d * self.h_pad * itemsize + 16 * self.h_pad * 4
        elif self.graph_pooling == 'max':
            fixed += g_pad * d * 4                       # tile-max scratch
        tn = (budget - fixed) // max(per_node, 1)
        tn = max(128, min(max_tn, (tn // 128) * 128))
        return min(tn, n_ceil)

    # ---------------- forward ---------------- #

    def __call__(self, hs, gs):
        batch = gs.batch.astype(jnp.int32)
        num_graphs = int(gs.num_graphs)
        n, d = hs.shape
        g_pad = _round_up(max(num_graphs, 1), 8)

        # Generation-aware VMEM limit / tile cap (v5e & v6e: 128 MiB physical;
        # v7x: 64 MiB).  Unknown -> conservative (safe everywhere).
        vmem_cap = _vmem_capacity_bytes()
        if vmem_cap >= 100 * 1024 * 1024:
            vmem_limit, max_tn = 96 * 1024 * 1024, 4096
        else:
            vmem_limit, max_tn = 48 * 1024 * 1024, 1024

        tn = self._pick_block_n(n, d, g_pad, vmem_limit, max_tn)
        tiles_total = _cdiv(n, tn)

        # Leading "parallel" axis: per-core partial reductions (2x on v7x).
        # On 1-TC chips only split when it adds no padding work.
        num_split = 1
        if tiles_total >= 2:
            if tiles_total % 2 == 0 or _num_tensorcores_per_device() >= 2:
                num_split = 2
        tiles_per_core = _cdiv(tiles_total, num_split)
        n_pad = num_split * tiles_per_core * tn
        if n_pad > n:
            hs = jnp.pad(hs, ((0, n_pad - n), (0, 0)))
            batch = jnp.pad(batch, (0, n_pad - n), constant_values=-1)

        grid = (num_split, tiles_per_core)
        hs_spec = pl.BlockSpec((tn, d), lambda c, i: (c * tiles_per_core + i, 0))
        seg_row_spec = pl.BlockSpec((1, tn), lambda c, i: (0, c * tiles_per_core + i))
        seg_col_spec = pl.BlockSpec((tn, 1), lambda c, i: (c * tiles_per_core + i, 0))
        out_spec = pl.BlockSpec((None, g_pad, d), lambda c, i: (c, 0, 0))
        vec_spec = pl.BlockSpec((None, g_pad, 1), lambda c, i: (c, 0, 0))
        compiler_params = pltpu.CompilerParams(
            dimension_semantics=("parallel", "arbitrary"),
            vmem_limit_bytes=vmem_limit,
        )
        io_bytes = n_pad * d * 4 + n_pad * 4 + num_split * g_pad * (d + 2) * 4
        pool_flops = 2 * n_pad * g_pad * d

        if self.graph_pooling in ('sum', 'mean'):
            mean = self.graph_pooling == 'mean'
            seg_row = batch.reshape(1, n_pad)
            if mean:
                out_shape = (jax.ShapeDtypeStruct((num_split, g_pad, d), jnp.float32),
                             jax.ShapeDtypeStruct((num_split, g_pad, 1), jnp.float32))
                out_specs = (out_spec, vec_spec)
            else:
                out_shape = jax.ShapeDtypeStruct((num_split, g_pad, d), jnp.float32)
                out_specs = out_spec
            kernel = functools.partial(_sum_mean_kernel, mean=mean)
            res = pl.pallas_call(
                kernel,
                grid=grid,
                in_specs=[seg_row_spec, hs_spec],
                out_specs=out_specs,
                out_shape=out_shape,
                compiler_params=compiler_params,
                cost_estimate=pl.CostEstimate(
                    flops=pool_flops, transcendentals=0, bytes_accessed=io_bytes),
            )(seg_row, hs)
            if mean:
                sums, cnts = res
                sums = jnp.sum(sums, axis=0)
                cnts = jnp.sum(cnts, axis=0)
                return (sums / jnp.maximum(cnts, 1.0))[:num_graphs]
            return jnp.sum(res, axis=0)[:num_graphs]

        if self.graph_pooling == 'max':
            # Masked-max needs node-major masks -> segment ids fed as (N, 1).
            seg_col = batch.reshape(n_pad, 1)
            n_chunks = g_pad // 8
            # Small G: fully static path, no scratch.  Large G: bounded loop over
            # 8-graph chunks staged in a (n_chunks, 8, D) VMEM scratch.
            scratch = [] if n_chunks <= 4 else [pltpu.VMEM((n_chunks, 8, d), jnp.float32)]
            out = pl.pallas_call(
                _max_kernel,
                grid=grid,
                in_specs=[seg_col_spec, hs_spec],
                out_specs=out_spec,
                out_shape=jax.ShapeDtypeStruct((num_split, g_pad, d), jnp.float32),
                scratch_shapes=scratch,
                compiler_params=compiler_params,
                cost_estimate=pl.CostEstimate(
                    flops=g_pad * n_pad * d, transcendentals=0,
                    bytes_accessed=io_bytes),
            )(seg_col, hs)
            return jnp.max(out, axis=0)[:num_graphs]

        # attention
        h_pad = self.h_pad
        seg_row = batch.reshape(1, n_pad)
        mlp_flops = 2 * n_pad * d * h_pad + 2 * n_pad * h_pad * 8
        w_itemsize = jnp.dtype(self.gate_dtype).itemsize
        const_spec = lambda shape: pl.BlockSpec(shape, lambda c, i: (0, 0))
        acc, m, l = pl.pallas_call(
            _attention_kernel,
            grid=grid,
            in_specs=[seg_row_spec, hs_spec,
                      const_spec((d, h_pad)),      # w1 (gate dtype)
                      const_spec((1, h_pad)),      # b1
                      const_spec((1, h_pad)),      # bn scale
                      const_spec((1, h_pad)),      # bn shift
                      const_spec((8, h_pad)),      # replicated w2
                      const_spec((1, 1))],         # b2
            out_specs=(out_spec, vec_spec, vec_spec),
            out_shape=(jax.ShapeDtypeStruct((num_split, g_pad, d), jnp.float32),
                       jax.ShapeDtypeStruct((num_split, g_pad, 1), jnp.float32),
                       jax.ShapeDtypeStruct((num_split, g_pad, 1), jnp.float32)),
            compiler_params=compiler_params,
            cost_estimate=pl.CostEstimate(
                flops=pool_flops + mlp_flops, transcendentals=2 * n_pad,
                bytes_accessed=io_bytes + d * h_pad * w_itemsize + 13 * h_pad * 4),
        )(seg_row, hs, self.w1_kernel, self.b1_kernel, self.bn_scale_kernel,
          self.bn_shift_kernel, self.w2_rep, self.b2)

        # Merge the per-core online-softmax partials and normalize.
        m_all = jnp.max(m, axis=0)                                    # (G_pad, 1)
        scale = jnp.where(m == -jnp.inf, 0.0, jnp.exp(m - m_all[None, :, :]))
        num = jnp.sum(scale * acc, axis=0)                            # (G_pad, D)
        den = jnp.sum(scale * l, axis=0)                              # (G_pad, 1)
        out = jnp.where(den > 0.0, num / jnp.maximum(den, 1e-30), 0.0)
        return out[:num_graphs]


# ----------------------------- reference + main ----------------------------- #

def _reference(mode, layer, hs, batch, num_graphs):
    if mode == 'sum':
        return jax.ops.segment_sum(hs, batch, num_graphs)
    if mode == 'mean':
        s = jax.ops.segment_sum(hs, batch, num_graphs)
        c = jax.ops.segment_sum(jnp.ones((hs.shape[0], 1), jnp.float32), batch,
                                num_graphs)
        return s / jnp.maximum(c, 1.0)
    if mode == 'max':
        return jax.ops.segment_max(hs, batch, num_graphs)
    # attention
    h1 = hs @ layer.w1 + layer.b1
    h1 = jnp.maximum(h1 * layer.bn_scale + layer.bn_shift, 0.0)
    gate = (h1 @ layer.w2 + layer.b2)[:, 0]
    gmax = jax.ops.segment_max(gate, batch, num_graphs)
    e = jnp.exp(gate - gmax[batch])
    den = jax.ops.segment_sum(e, batch, num_graphs)
    alpha = e / den[batch]
    return jax.ops.segment_sum(alpha[:, None] * hs, batch, num_graphs)


def _check(mode, layer, hs, batch, gs, num_graphs):
    out = jax.block_until_ready(layer(hs, gs))
    ref = _reference(mode, layer, hs, batch, num_graphs)
    if not jnp.allclose(out, ref, atol=5e-4, rtol=5e-4):
        err = float(jnp.max(jnp.abs(out - ref)))
        raise AssertionError(f"mismatch for pooling mode {mode!r} (max err {err})")


if __name__ == "__main__":
    key = jax.random.PRNGKey(0)
    k_feat, k_param, k_feat2 = jax.random.split(key, 3)

    # NOTE: empty graphs produce -inf rows (max) / 0 rows (mean, attention); the
    # test batches below have no empty graphs, matching typical PyG usage.
    D = 32

    # Case 1: small G, multiple node tiles (block_n=128 -> 4 tiles, so the
    # per-core split + resident-accumulator / online-softmax multi-tile paths
    # and the seg=-1 node padding are all exercised).
    N, G = 500, 3
    hs = jax.random.normal(k_feat, (N, D), jnp.float32)
    batch = jnp.concatenate([
        jnp.full((200,), 0, jnp.int32),
        jnp.full((180,), 1, jnp.int32),
        jnp.full((120,), 2, jnp.int32),
    ])
    gs = GraphBatch(batch=batch, num_graphs=G)
    for mode in ('sum', 'mean', 'max', 'attention'):
        layer = ReadoutLayer({'pooling': mode, 'emb_dim': D, 'block_n': 128},
                             key=k_param)
        _check(mode, layer, hs, batch, gs, G)

    # Case 2: many graphs (G=40 -> 5 chunks of 8) with auto block_n: exercises
    # generation-aware sizing and the bounded-loop path in the max kernel.
    N2, G2 = 380, 40
    hs2 = jax.random.normal(k_feat2, (N2, D), jnp.float32)
    batch2 = ((jnp.arange(N2) * G2) // N2).astype(jnp.int32)
    gs2 = GraphBatch(batch=batch2, num_graphs=G2)
    for mode in ('sum', 'mean', 'max', 'attention'):
        layer = ReadoutLayer({'pooling': mode, 'emb_dim': D}, key=k_param)
        _check(mode, layer, hs2, batch2, gs2, G2)

    print("KERNEL_OK")
</pallas_src>

<mosaic_0001>
module attributes {stable_mosaic.version = 11 : i64} {
  func.func @_sum_mean_kernel(%arg0: i32, %arg1: i32, %arg2: memref<1x128xi32, #tpu.memory_space<vmem>>, %arg3: memref<128x32xf32, #tpu.memory_space<vmem>>, %arg4: memref<1x8x32xf32, #tpu.memory_space<vmem>>) attributes {dimension_semantics = [#tpu.dimension_semantics<parallel>, #tpu.dimension_semantics<arbitrary>], iteration_bounds = array<i64: 2, 2>, scalar_prefetch = 0 : i64, scratch_operands = 0 : i64, tpu.core_type = #tpu.core_type<tc>, window_params = [{transform_indices = @transform_0, window_bounds = array<i64: 1, 128>}, {transform_indices = @transform_1, window_bounds = array<i64: 128, 32>}, {transform_indices = @transform_2, window_bounds = array<i64: 1, 8, 32>}]} {
    %c0_i32 = arith.constant 0 : i32
    %0 = arith.cmpi eq, %arg1, %c0_i32 : i32
    %1 = arith.extui %0 : i1 to i32
    %c0_i32_0 = arith.constant 0 : i32
    %2 = arith.cmpi ne, %1, %c0_i32_0 : i32
    scf.if %2 {
      %cst_10 = arith.constant 0.000000e+00 : f32
      %17 = vector.broadcast %cst_10 : f32 to vector<8x32xf32>
      %c0_11 = arith.constant 0 : index
      %c0_12 = arith.constant 0 : index
      %c0_13 = arith.constant 0 : index
      %18 = vector.load %arg4[%c0_11, %c0_12, %c0_13] : memref<1x8x32xf32, #tpu.memory_space<vmem>>, vector<1x8x32xf32>
      %19 = vector.shape_cast %18 : vector<1x8x32xf32> to vector<8x32xf32>
      %20 = vector.shape_cast %17 : vector<8x32xf32> to vector<1x8x32xf32>
      tpu.vector_store %arg4[%c0_11, %c0_12, %c0_13], %20 {strides = array<i32>} : memref<1x8x32xf32, #tpu.memory_space<vmem>>, vector<1x8x32xf32>,
    } else {
    }
    %c0 = arith.constant 0 : index
    %c0_1 = arith.constant 0 : index
    %3 = vector.load %arg2[%c0, %c0_1] : memref<1x128xi32, #tpu.memory_space<vmem>>, vector<1x128xi32>
    %c0_2 = arith.constant 0 : index
    %c0_3 = arith.constant 0 : index
    %4 = vector.load %arg3[%c0_2, %c0_3] : memref<128x32xf32, #tpu.memory_space<vmem>>, vector<128x32xf32>
    %5 = tpu.iota {dimensions = array<i32: 0>} : vector<8x128xi32>
    %6 = vector.broadcast %3 : vector<1x128xi32> to vector<8x128xi32>
    %7 = arith.cmpi eq, %5, %6 : vector<8x128xi32>
    %8 = arith.extui %7 : vector<8x128xi1> to vector<8x128xi32>
    %9 = arith.sitofp %8 : vector<8x128xi32> to vector<8x128xf32>
    %c0_4 = arith.constant 0 : index
    %c0_5 = arith.constant 0 : index
    %c0_6 = arith.constant 0 : index
    %10 = vector.load %arg4[%c0_4, %c0_5, %c0_6] : memref<1x8x32xf32, #tpu.memory_space<vmem>>, vector<1x8x32xf32>
    %11 = vector.shape_cast %10 : vector<1x8x32xf32> to vector<8x32xf32>
    %cst = arith.constant dense<0.000000e+00> : vector<8x32xf32>
    %12 = tpu.matmul %9, %4, %cst {dimension_numbers = #tpu.dot_dimension_numbers<[1], [0], [0], [1], [0, 0, 1, 1], [], []>} : vector<8x128xf32>, vector<128x32xf32>, vector<8x32xf32> -> vector<8x32xf32>
    %13 = arith.addf %11, %12 : vector<8x32xf32>
    %c0_7 = arith.constant 0 : index
    %c0_8 = arith.constant 0 : index
    %c0_9 = arith.constant 0 : index
    %14 = vector.load %arg4[%c0_7, %c0_8, %c0_9] : memref<1x8x32xf32, #tpu.memory_space<vmem>>, vector<1x8x32xf32>
    %15 = vector.shape_cast %14 : vector<1x8x32xf32> to vector<8x32xf32>
    %16 = vector.shape_cast %13 : vector<8x32xf32> to vector<1x8x32xf32>
    tpu.vector_store %arg4[%c0_7, %c0_8, %c0_9], %16 {strides = array<i32>} : memref<1x8x32xf32, #tpu.memory_space<vmem>>, vector<1x8x32xf32>,
    return
  }
  func.func @transform_0(%arg0: i32, %arg1: i32) -> (i32, i32) {
    %c2_i32 = arith.constant 2 : i32
    %0 = arith.muli %arg0, %c2_i32 : i32
    %1 = arith.addi %0, %arg1 : i32
    %c0_i32 = arith.constant 0 : i32
    %c0_i32_0 = arith.constant 0 : i32
    return %c0_i32, %1 : i32, i32
  }
  func.func @transform_1(%arg0: i32, %arg1: i32) -> (i32, i32) {
    %c2_i32 = arith.constant 2 : i32
    %0 = arith.muli %arg0, %c2_i32 : i32
    %1 = arith.addi %0, %arg1 : i32
    %c0_i32 = arith.constant 0 : i32
    %c0_i32_0 = arith.constant 0 : i32
    return %1, %c0_i32 : i32, i32
  }
  func.func @transform_2(%arg0: i32, %arg1: i32) -> (i32, i32, i32) {
    %c0_i32 = arith.constant 0 : i32
    %c0_i32_0 = arith.constant 0 : i32
    %c0_i32_1 = arith.constant 0 : i32
    return %arg0, %c0_i32, %c0_i32_0 : i32, i32, i32
  }
}

</mosaic_0001>

<bundles_post_ra>
// kernel: tpu_custom_call.1
= control target key start
LH: loop header
LB: loop body
LE: loop exit
PB: predicated region body
PF: predicated region fallthrough
CT: control target
= control target key end

     0   :  { %7 = vsyncpa [#allocation3], 0  ;;  %s860_s0 = inlined_call_operand.vmem [shape: s32[1,512], index: 0, kind: input, shape index: {}]   ;;  %s861_s1 = inlined_call_operand.vmem [shape: f32[512,32], index: 1, kind: input, shape index: {}]   ;;  %s862_s2 = inlined_call_operand.hbm [shape: f32[2,8,32], index: 2, kind: output, shape index: {}]  }
   0x1   :  { %9 = vsyncpa [#allocation3 + $0x1], 0  ;;  %s688_s9 = smov 0   ;;  %s690_s10 = smov 0  }
   0x2   :  { %s692_s11 = smov 0   ;;  %s694_s12 = smov 0  }
   0x3   :  { %s696_s13 = smov 0   ;;  %s698_s14 = smov 0  }
   0x4   :  { %s700_s15 = smov 0   ;;  %s702_s16 = smov 0  }
   0x5 LB: > { %s397_s17 = sadd.s32 4294967295, %s665_s16   ;;  %s398_s18 = sadd.s32 4294967294, %s665_s16   ;;  %s665_s16 = sphi %s702_s16, %s15_s16   ;;  %s661_s15 = sphi %s700_s15, %s871_s15   ;;  %s657_s14 = sphi %s698_s14, %s870_s14   ;;  %s653_s13 = sphi %s696_s13, %s869_s13   ;;  %s649_s12 = sphi %s694_s12, %s868_s12   ;;  %s645_s11 = sphi %s692_s11, %s867_s11   ;;  %s641_s10 = sphi %s690_s10, %s866_s10   ;;  %s637_s9 = sphi %s688_s9, %s865_s9  }
   0x6   : > { %s24_s19 = sadd.s32 1, %s657_s14  ;;  %s27_s20 = sadd.s32 1, %s661_s15 }
   0x7   : > { %p25_p0 = scmp.ge.s32.totalorder %s24_s19, 2  ;;  %p104_p1 = scmp.ne.s32.totalorder %s645_s11, %s641_s10 }
   0x8   : > { %p105_p2 = scmp.eq.s32.totalorder %s397_s17, 3  ;;  %p110_p4 = scmp.ne.s32.totalorder %s641_s10, %s637_s9 }
   0x9   : > { %s873_s19 = smov (%p25_p0, %s24_s19), 0  ;;  %s875_s20 = smov (!%p25_p0, %s27_s20), %s661_s15 }
   0xa   : > { %p737_p3 = por %p105_p2, %p104_p1  ;;  %p29_p5 = scmp.ge.s32.totalorder %s875_s20, 2 }
   0xb   : > { %p111_p6 = scmp.eq.s32.totalorder %s398_s18, 3  ;;  %p405_p7 = scmp.ge.s32.totalorder %s665_s16, 1 }
   0xc   : > { %p152_p8 = scmp.lt.s32.totalorder %s665_s16, 5  ;;  %s877_s20 = smov (%p29_p5, %s875_s20), 0 }
   0xd   : > { %p747_p9 = por %p111_p6, %p110_p4  ;;  %s91_s23 = ssub.s32 %s661_s15, %s877_s20 }
   0xe   : > { %p153_p10 = pnand %p405_p7, %p152_p8  ;;  %s94_s24 = sadd.s32 1, %s645_s11 }
   0xf   : > { %p92_p11 = scmp.eq.s32.totalorder %s91_s23, 0  ;;  %s178_s26 = sand.u32 (!%p153_p10), 1, %s641_s10  }
  0x10   : > { %156 = sbr.rel (%p153_p10) target bundleno = 294 (0x126), region = 28  ;;  %s407_s27 = sshll.u32 (!%p153_p10), %s653_s13, 1 }
  0x11   : > { %s755_s25 = scalar_select %p92_p11, %s645_s11, %s94_s24  }
  0x12   : > { %s406_s28 = sshll.u32 (!%p153_p10), %s178_s26, 3  ;;  %s182_s29 = sadd.s32 (!%p153_p10), %s649_s12, %s407_s27 }
  0x13   : > { %p183_p12 = scmp.lt.s32.totalorder (!%p153_p10), %s182_s29, 3  ;;  %s409_s30 = sshll.u32 (!%p153_p10), %s182_s29, 4 }
  0x14   : > { %p191_p13 = scmp.lt.s32.totalorder (!%p153_p10), %s409_s30, 63  ;;  %s773_s18 = scalar_lea.vmem (!%p153_p10), [#allocation2], %s406_s28 }
  0x15   : > { %p411_p0 = scmp.ne.s32.totalorder (!%p153_p10), %s649_s12, 0 }
  0x17   : > { %s879_s29 = smov (!%p183_p12, %s182_s29), 3  ;;  %s881_s30 = smov (!%p191_p13, %s409_s30), 63 }
  0x18   : > { %s185_s5 = scalar_lea.vmem %s860_s0, %s879_s29  ;;  %s410_s6 = sshll.u32 %s881_s30, 3  ;;  %vm202_vm0 = vcmask (!%p411_p0), 261120   ;;  %v667_v0 = vmov (!%p411_p0), 0.0  }
  0x19   : > { %s771_s17 = scalar_lea.vmem %s861_s1, %s410_s6  ;;  %201 = sbr.rel (%p411_p0) target bundleno = 32 (0x20), region = 32  ;;  %203 = vst.msk [vmem:[%s773_s18] sm:$0xff] (!%p411_p0), %vm202_vm0, %v667_v0 }
  0x20 PF: > { %v205_v1 = vld [vmem:[%s771_s17] sm:$0xff]  ;;  %v206_v2 = vld [vmem:[%s771_s17 + $0x8] sm:$0xff]  ;;  %v207_v3 = vld [vmem:[%s771_s17 + $0x10] sm:$0xff]  ;;  %v668_v4 = vmov 0.0|0.0   ;;  %vm669_vm1 = vmmov 0   ;;  %v670_v7 = vmov 0.0   ;;  %v221_v24 = vlaneseq }
  0x21   : > { %471 = vmatprep.subr.bf16.mxu0 %v668_v4  ;;  %v472_v5 = vpack.c.bf16 %v206_v2, %v205_v1  ;;  %v208_v6 = vld [vmem:[%s771_s17 + $0x18] sm:$0xff]  ;;  %468 = vmatprep.mubr.msk.f32.mxu0 %vm669_vm1, %v670_v7  ;;  %v209_v9 = vld [vmem:[%s771_s17 + $0x20] sm:$0xff]  ;;  %v210_v10 = vld [vmem:[%s771_s17 + $0x28] sm:$0xff]  ;;  %v671_v30 = vmov 1.0   ;;  %s416_s24 = sshll.u32 %s653_s13, 7  ;;  %s318_s27 = sshll.u32 %s773_s18, 4  ;;  %s806_s27 = int_to_ptr.vmem [resolvable:$true] %s318_s27 }
  0x22   : > { %v475_v8 = vpack.c.bf16 %v208_v6, %v207_v3  ;;  %v478_v11 = vpack.c.bf16 %v210_v10, %v209_v9  ;;  %v211_v12 = vld [vmem:[%s771_s17 + $0x30] sm:$0xff]  ;;  %v212_v13 = vld [vmem:[%s771_s17 + $0x38] sm:$0xff]  ;;  %v213_v15 = vld [vmem:[%s771_s17 + $0x40] sm:$0xff]  ;;  %v222_v28 = vshrl.u32 %v221_v24, 7  ;;  %vm302_vm3 = vcmask 261120   ;;  %s804_s3 = scalar_lea.hbm %s862_s2, %s416_s24  ;;  %s305_s29 = scalar_lea.sflag [#allocation3], %s178_s26 }
  0x23   : > { %473 = vmatpush3.bf16.msra.mxu0 %v472_v5  ;;  %v481_v14 = vpack.c.bf16 %v212_v13, %v211_v12  ;;  %v214_v16 = vld [vmem:[%s771_s17 + $0x48] sm:$0xff]  ;;  %v215_v18 = vld [vmem:[%s771_s17 + $0x50] sm:$0xff]  ;;  %v216_v19 = vld [vmem:[%s771_s17 + $0x58] sm:$0xff]  ;;  %s571_s4 = scalar_lea.vmem %s806_s27, 128  ;;  %s672_s13 = smov [#allocation2]  }
  0x24   : > { %474 = vmatprep.subr.bf16.mxu0 %v668_v4  ;;  %v484_v17 = vpack.c.bf16 %v214_v16, %v213_v15  ;;  %v487_v20 = vpack.c.bf16 %v216_v19, %v215_v18  ;;  %v217_v21 = vld [vmem:[%s771_s17 + $0x60] sm:$0xff]  ;;  %v218_v22 = vld [vmem:[%s771_s17 + $0x68] sm:$0xff]  ;;  %v219_v25 = vld [vmem:[%s771_s17 + $0x70] sm:$0xff]  ;;  %p572_p1 = scmp.ne.s32.totalorder %s806_s27, %s571_s4 }
  0x25   : > { %v490_v23 = vpack.c.bf16 %v218_v22, %v217_v21  ;;  %v220_v26 = vld [vmem:[%s771_s17 + $0x78] sm:$0xff]  ;;  %v412_v29 = vld [vmem:[%s185_s5] ss:$0 sm:$0xff]  ;;  %s575_s5 = sshll.u32 %s672_s13, 4  ;;  %s576_s5 = int_to_ptr.vmem [resolvable:$false] %s575_s5 }
  0x26   : > { %v493_v27 = vpack.c.bf16 %v220_v26, %v219_v25  ;;  %vm227_vm2 = vcmp.eq.s32.totalorder %v222_v28, %v412_v29  ;;  %v230_v31 = vld [vmem:[%s773_s18] sm:$0xff]  ;;  %p573_p2 = pnand %p572_p1, %p737_p3  ;;  %s577_s6 = scalar_lea.vmem %s576_s5, 256 }
  0x27   : > { %476 = vmatpush3.bf16.msra.mxu0 %v475_v8  ;;  %p578_p5 = scmp.lt.s32.totalorder %s806_s27, %s576_s5  ;;  %p579_p6 = scmp.lt.s32.totalorder %s577_s6, %s571_s4 }
  0x28   : > { %477 = vmatprep.subr.bf16.mxu0 %v668_v4  ;;  %p574_p4 = pneg %p573_p2 }
  0x29   : > { %p580_p7 = por %p579_p6, %p578_p5 }
  0x2b   : > { %479 = vmatpush3.bf16.msra.mxu0 %v478_v11  ;;  %p581_p8 = pnand %p580_p7, %p574_p4 }
  0x2c   : > { %480 = vmatprep.subr.bf16.mxu0 %v668_v4 }
  0x2f   : > { %482 = vmatpush3.bf16.msra.mxu0 %v481_v14 }
  0x30   : > { %483 = vmatprep.subr.bf16.mxu0 %v668_v4 }
  0x33   : > { %485 = vmatpush3.bf16.msra.mxu0 %v484_v17 }
  0x34   : > { %486 = vmatprep.subr.bf16.mxu0 %v668_v4 }
  0x37   : > { %488 = vmatpush3.bf16.msra.mxu0 %v487_v20 }
  0x38   : > { %489 = vmatprep.subr.bf16.mxu0 %v668_v4 }
  0x3b   : > { %491 = vmatpush3.bf16.msra.mxu0 %v490_v23 }
  0x3c   : > { %492 = vmatprep.subr.bf16.mxu0 %v668_v4 }
  0x3f   : > { %494 = vmatpush3.bf16.msra.mxu0 %v493_v27 }
  0x42   : > { %469 = vmatmul.mubr.msk.f32.vlgmr.msra.gmra.mrb[0].mxu0 %vm227_vm2, %v671_v30 }
 0x115   : > { %v297_v32 = vpop.f32.mrb[0].mxu0 }
 0x116   : > { %v301_v33 = vadd.f32 %v297_v32, %v230_v31  ;;  %v470_v34 = vpop.f32.mrb[1].mxu0 }
 0x118   : > { %303 = vst.msk [vmem:[%s773_s18] sm:$0xff] %vm302_vm3, %v301_v33 }
 0x119   : > { %584 = shalt.err (!%p581_p8)
}
 0x11a   : > { %s585_s26 = scalar_lea.hbm %s804_s3, 128  ;;  %s589_s17 = scalar_lea.hbm %s862_s2, 256 }
 0x11b   : > { %p586_p10 = scmp.ne.s32.totalorder %s804_s3, %s585_s26  ;;  %p590_p13 = scmp.lt.u32.totalorder %s804_s3, %s862_s2 }
 0x11c   : > { %p591_p0 = scmp.lt.u32.totalorder %s589_s17, %s585_s26  ;;  %p593_p2 = scmp.lt.u32.totalorder %s585_s26, %s804_s3 }
 0x11d   : > { %p587_p11 = pnand %p586_p10, %p737_p3 }
 0x11e   : > { %p592_p1 = por %p591_p0, %p590_p13 }
 0x11f   : > { %p588_p12 = pneg %p587_p11 }
 0x120   : > { %p594_p4 = por %p593_p2, %p592_p1 }
 0x122   : > { %p595_p5 = pnand %p594_p4, %p588_p12 }
 0x124   : > { %598 = shalt.err (!%p595_p5)
}
 0x125   : > { %495 = dma.vmem_to_hbm [thread:$0]  (%p737_p3), %s806_s27, 128, %s804_s3, %s305_s29  }
 0x126 PF: > { %p501_p6 = scmp.ge.s32.totalorder %s665_s16, 2  ;;  %s330_s23 = sand.u32 1, %s637_s9  }
 0x127   : > { %s331_s24 = scalar_lea.sflag [#allocation3], %s330_s23 }
 0x128   : > { %p498_p7 = pnand %p501_p6, %p747_p9 }
 0x12a   : > { %632 = dma.done.wait (!%p498_p7), %s331_s24, 128  }
 0x12b   : > { %634 = vsyncadd (!%p498_p7), %s331_s24, 4294967168  ;;  %s15_s16 = sadd.s32 1, %s665_s16   ;;  %s865_s9 = smov %s641_s10 }
 0x12c   : > { %p12_p8 = scmp.ge.s32.totalorder %s15_s16, 6   ;;  %s866_s10 = smov %s645_s11 }
 0x12d   : > { %s867_s11 = smov %s755_s25  ;;  %s868_s12 = smov %s657_s14 }
 0x12e   : > { %s869_s13 = smov %s661_s15  ;;  %s870_s14 = smov %s873_s19 }
 0x12f   : > { %s871_s15 = smov %s877_s20  ;;  %14 = sbr.rel (!%p12_p8) target bundleno = 5 (0x5), region = 70 }
 0x136   :  { %336 = vsyncpa [#allocation3], 1 }
 0x137   :  { %338 = vsyncpa [#allocation3 + $0x1], 1 }

</bundles_post_ra>
